<compile_context>
chip_gen: v7x
topology: tpu7x:2x2x1
jax: 0.10.0
libtpu: 0.0.40
codegen_flags: <defaults>
</compile_context>

<pallas_src>
import functools

import jax
import jax.numpy as jnp
from jax import lax
from jax.experimental import pallas as pl
from jax.experimental.pallas import tpu as pltpu


# ------------------------------ tiling helpers ------------------------------ #

def _pick_tile_m(M, cap=256):
    """Largest multiple-of-8 divisor of M (<= cap) that still gives >=2 grid
    steps (so the grid axis can be split across TensorCores on v7x)."""
    cands = [t for t in (256, 128, 64, 32, 16, 8) if t <= cap and M % t == 0]
    for t in cands:
        if M // t >= 2:
            return t
    return cands[0] if cands else M


def _pick_tile_n(N, cap=512):
    for t in (512, 256, 128):
        if t <= cap and N % t == 0:
            return t
    return N


def _cparams(*sem):
    # 32 MiB fits the scoped VMEM budget on v5e/v6e/v7x alike.
    return pltpu.CompilerParams(dimension_semantics=sem,
                                vmem_limit_bytes=32 * 1024 * 1024)


# ----------------------------- Pallas kernels ------------------------------ #

def _ln_linear_kernel(x_ref, g_ref, b_ref, w_ref, wb_ref, o_ref, *, eps):
    """LayerNorm (f32) fused as prologue of a bf16 MXU matmul."""
    x = x_ref[...].astype(jnp.float32)
    mu = jnp.mean(x, axis=-1, keepdims=True)
    var = jnp.mean(jnp.square(x - mu), axis=-1, keepdims=True)
    xn = (x - mu) * lax.rsqrt(var + eps)
    xn = xn * g_ref[...] + b_ref[...]
    y = jnp.dot(xn.astype(jnp.bfloat16), w_ref[...],
                preferred_element_type=jnp.float32) + wb_ref[...]
    o_ref[...] = y.astype(o_ref.dtype)


def ln_linear(x, g, b, w, wb, *, eps=1e-5):
    """x:[M,H] f32, w:[H,N] bf16, wb:[N] f32 -> LN(x) @ w + wb  (f32, [M,N])."""
    M, H = x.shape
    N = w.shape[1]
    tm, tn = _pick_tile_m(M), _pick_tile_n(N)
    # TODO(synk): add a K-reduction grid axis + VMEM accumulator for large H.
    return pl.pallas_call(
        functools.partial(_ln_linear_kernel, eps=eps),
        out_shape=jax.ShapeDtypeStruct((M, N), jnp.float32),
        grid=(M // tm, N // tn),
        in_specs=[
            pl.BlockSpec((tm, H), lambda i, j: (i, 0)),
            pl.BlockSpec((1, H), lambda i, j: (0, 0)),
            pl.BlockSpec((1, H), lambda i, j: (0, 0)),
            pl.BlockSpec((H, tn), lambda i, j: (0, j)),
            pl.BlockSpec((1, tn), lambda i, j: (0, j)),
        ],
        out_specs=pl.BlockSpec((tm, tn), lambda i, j: (i, j)),
        compiler_params=_cparams("parallel", "parallel"),
    )(x, g.reshape(1, H), b.reshape(1, H), w, wb.reshape(1, N))


def _linear_residual_kernel(x_ref, w_ref, wb_ref, res_ref, o_ref):
    y = jnp.dot(x_ref[...].astype(jnp.bfloat16), w_ref[...],
                preferred_element_type=jnp.float32)
    o_ref[...] = (y + wb_ref[...] + res_ref[...]).astype(o_ref.dtype)


def linear_residual(x, w, wb, res):
    """res + x @ w + wb  (bf16 MXU matmul, residual add fused in epilogue)."""
    M, K = x.shape
    N = w.shape[1]
    tm, tn = _pick_tile_m(M), _pick_tile_n(N)
    return pl.pallas_call(
        _linear_residual_kernel,
        out_shape=jax.ShapeDtypeStruct((M, N), jnp.float32),
        grid=(M // tm, N // tn),
        in_specs=[
            pl.BlockSpec((tm, K), lambda i, j: (i, 0)),
            pl.BlockSpec((K, tn), lambda i, j: (0, j)),
            pl.BlockSpec((1, tn), lambda i, j: (0, j)),
            pl.BlockSpec((tm, tn), lambda i, j: (i, j)),
        ],
        out_specs=pl.BlockSpec((tm, tn), lambda i, j: (i, j)),
        compiler_params=_cparams("parallel", "parallel"),
    )(x, w, wb.reshape(1, N), res)


def _ln_mlp_residual_kernel(x_ref, g_ref, b_ref, wfc_ref, bfc_ref,
                            wpr_ref, bpr_ref, o_ref, *, eps):
    """Whole MLP block in one kernel: x + proj(gelu(fc(LN(x))))."""
    x = x_ref[...].astype(jnp.float32)
    mu = jnp.mean(x, axis=-1, keepdims=True)
    var = jnp.mean(jnp.square(x - mu), axis=-1, keepdims=True)
    xn = (x - mu) * lax.rsqrt(var + eps)
    xn = xn * g_ref[...] + b_ref[...]
    h = jnp.dot(xn.astype(jnp.bfloat16), wfc_ref[...],
                preferred_element_type=jnp.float32) + bfc_ref[...]
    # GPT-2 "new" gelu (tanh approximation), f32 on the VPU/EUP
    h = 0.5 * h * (1.0 + jnp.tanh(0.7978845608028654 * (h + 0.044715 * h * h * h)))
    y = jnp.dot(h.astype(jnp.bfloat16), wpr_ref[...],
                preferred_element_type=jnp.float32) + bpr_ref[...]
    o_ref[...] = (x + y).astype(o_ref.dtype)


def ln_mlp_residual(x, g, b, wfc, bfc, wpr, bpr, *, eps=1e-5):
    M, H = x.shape
    F = wfc.shape[1]
    tm = _pick_tile_m(M)
    return pl.pallas_call(
        functools.partial(_ln_mlp_residual_kernel, eps=eps),
        out_shape=jax.ShapeDtypeStruct((M, H), jnp.float32),
        grid=(M // tm,),
        in_specs=[
            pl.BlockSpec((tm, H), lambda i: (i, 0)),
            pl.BlockSpec((1, H), lambda i: (0, 0)),
            pl.BlockSpec((1, H), lambda i: (0, 0)),
            pl.BlockSpec((H, F), lambda i: (0, 0)),
            pl.BlockSpec((1, F), lambda i: (0, 0)),
            pl.BlockSpec((F, H), lambda i: (0, 0)),
            pl.BlockSpec((1, H), lambda i: (0, 0)),
        ],
        out_specs=pl.BlockSpec((tm, H), lambda i: (i, 0)),
        compiler_params=_cparams("parallel"),
    )(x, g.reshape(1, H), b.reshape(1, H), wfc, bfc.reshape(1, F),
      wpr, bpr.reshape(1, H))


def _attn_kernel(qkv_ref, pk_ref, pv_ref, bias_ref, ctx_ref, ko_ref, vo_ref,
                 *, n_head, head_dim, hidden, past_len, scale):
    """Per-batch-element attention over all heads.

    qkv_ref : (1, S, 3H)   fused QKV activations (f32)
    pk_ref  : (1, nH, P, Dh) past keys, pv_ref same for values
    bias_ref: (1, 1, T)    additive padding bias
    ctx_ref : (1, S, H)    lane-dense attention output
    ko/vo   : (1, nH, T, Dh) presents (past ++ new), written in-kernel
    """
    S = qkv_ref.shape[1]
    qkv = qkv_ref[0]                    # [S, 3H] f32
    pad_bias = bias_ref[0]              # [1, T]  f32

    # causal mask only matters within the new-key block (past keys are always
    # earlier than every query position) -- generated in-kernel, no HBM bias.
    row = lax.broadcasted_iota(jnp.int32, (S, S), 0)
    col = lax.broadcasted_iota(jnp.int32, (S, S), 1)
    causal = jnp.where(col <= row, 0.0, -1e9).astype(jnp.float32)

    dn = (((1,), (1,)), ((), ()))       # contract last dims, no explicit .T

    for h in range(n_head):             # static unroll; heads share the block
        q = qkv[:, h * head_dim:(h + 1) * head_dim].astype(jnp.bfloat16)
        kn = qkv[:, hidden + h * head_dim: hidden + (h + 1) * head_dim]
        vn = qkv[:, 2 * hidden + h * head_dim: 2 * hidden + (h + 1) * head_dim]

        # presents: past ++ new, written directly (no host-side concatenate)
        if past_len > 0:
            pk = pk_ref[0, h]           # [P, Dh]
            pv = pv_ref[0, h]
            ko_ref[0, h, 0:past_len, :] = pk
            vo_ref[0, h, 0:past_len, :] = pv
        ko_ref[0, h, past_len:past_len + S, :] = kn
        vo_ref[0, h, past_len:past_len + S, :] = vn

        s_new = lax.dot_general(q, kn.astype(jnp.bfloat16), dn,
                                preferred_element_type=jnp.float32)
        s_new = s_new * scale + causal + pad_bias[:, past_len:past_len + S]

        if past_len > 0:
            s_past = lax.dot_general(q, pk.astype(jnp.bfloat16), dn,
                                     preferred_element_type=jnp.float32)
            s_past = s_past * scale + pad_bias[:, 0:past_len]
            m = jnp.maximum(jnp.max(s_new, axis=-1, keepdims=True),
                            jnp.max(s_past, axis=-1, keepdims=True))
            p_new = jnp.exp(s_new - m)
            p_past = jnp.exp(s_past - m)
            l = (jnp.sum(p_new, axis=-1, keepdims=True)
                 + jnp.sum(p_past, axis=-1, keepdims=True))
            ctx = (jnp.dot(p_new.astype(jnp.bfloat16), vn.astype(jnp.bfloat16),
                           preferred_element_type=jnp.float32)
                   + jnp.dot(p_past.astype(jnp.bfloat16), pv.astype(jnp.bfloat16),
                             preferred_element_type=jnp.float32))
        else:
            m = jnp.max(s_new, axis=-1, keepdims=True)
            p_new = jnp.exp(s_new - m)
            l = jnp.sum(p_new, axis=-1, keepdims=True)
            ctx = jnp.dot(p_new.astype(jnp.bfloat16), vn.astype(jnp.bfloat16),
                          preferred_element_type=jnp.float32)

        ctx = ctx * pl.reciprocal(l, approx=True)
        ctx_ref[0, :, h * head_dim:(h + 1) * head_dim] = ctx.astype(ctx_ref.dtype)


def attention(qkv, past_k, past_v, pad_bias, *, n_head, head_dim, past_len):
    """qkv:[B,S,3H], past_k/v:[B,nH,P,Dh], pad_bias:[B,1,T]
    -> (ctx [B,S,H], k_present [B,nH,T,Dh], v_present [B,nH,T,Dh])."""
    # TODO(synk): past_len == 0 (empty cache) would need a no-past kernel variant.
    B, S, three_h = qkv.shape
    hidden = n_head * head_dim
    T = past_len + S
    kernel = functools.partial(
        _attn_kernel, n_head=n_head, head_dim=head_dim, hidden=hidden,
        past_len=past_len, scale=1.0 / (head_dim ** 0.5))
    return pl.pallas_call(
        kernel,
        out_shape=(
            jax.ShapeDtypeStruct((B, S, hidden), jnp.float32),
            jax.ShapeDtypeStruct((B, n_head, T, head_dim), jnp.float32),
            jax.ShapeDtypeStruct((B, n_head, T, head_dim), jnp.float32),
        ),
        grid=(B,),
        in_specs=[
            pl.BlockSpec((1, S, three_h), lambda b: (b, 0, 0)),
            pl.BlockSpec((1, n_head, past_len, head_dim), lambda b: (b, 0, 0, 0)),
            pl.BlockSpec((1, n_head, past_len, head_dim), lambda b: (b, 0, 0, 0)),
            pl.BlockSpec((1, 1, T), lambda b: (b, 0, 0)),
        ],
        out_specs=(
            pl.BlockSpec((1, S, hidden), lambda b: (b, 0, 0)),
            pl.BlockSpec((1, n_head, T, head_dim), lambda b: (b, 0, 0, 0)),
            pl.BlockSpec((1, n_head, T, head_dim), lambda b: (b, 0, 0, 0)),
        ),
        compiler_params=_cparams("parallel"),
    )(qkv, past_k, past_v, pad_bias)


# --------------------------- model (glue in JAX) ---------------------------- #

def init_params(key, cfg):
    V, H, L, P = cfg["vocab"], cfg["hidden"], cfg["n_layer"], cfg["max_pos"]

    def norm(k, shape, scale=0.02, dtype=jnp.float32):
        return (jax.random.normal(k, shape, jnp.float32) * scale).astype(dtype)

    keys = iter(jax.random.split(key, 4 + L * 8))
    params = {
        "wte": norm(next(keys), (V, H)),
        "wpe": norm(next(keys), (P, H)),
        "ln_f_g": jnp.ones((H,), jnp.float32),
        "ln_f_b": jnp.zeros((H,), jnp.float32),
        # matmul weights stored bf16 (MXU operands, halved DMA); biases f32
        "lm_head_w": norm(next(keys), (H, V), dtype=jnp.bfloat16),
        "lm_head_b": jnp.zeros((V,), jnp.float32),
        "layers": [],
    }
    for _ in range(L):
        params["layers"].append({
            "ln1_g": jnp.ones((H,), jnp.float32),
            "ln1_b": jnp.zeros((H,), jnp.float32),
            "w_qkv": norm(next(keys), (H, 3 * H), dtype=jnp.bfloat16),
            "b_qkv": jnp.zeros((3 * H,), jnp.float32),
            "w_o": norm(next(keys), (H, H), dtype=jnp.bfloat16),
            "b_o": jnp.zeros((H,), jnp.float32),
            "ln2_g": jnp.ones((H,), jnp.float32),
            "ln2_b": jnp.zeros((H,), jnp.float32),
            "w_fc": norm(next(keys), (H, 4 * H), dtype=jnp.bfloat16),
            "b_fc": jnp.zeros((4 * H,), jnp.float32),
            "w_proj": norm(next(keys), (4 * H, H), dtype=jnp.bfloat16),
            "b_proj": jnp.zeros((H,), jnp.float32),
        })
    return params


def net_forward(params, input_ids, pastkv, mask, cfg):
    """Mirrors Net.forward -> model(input_ids, attention_mask, past_key_values,
    return_dict=False) = (logits, presents)."""
    B, S = input_ids.shape
    H, nH = cfg["hidden"], cfg["n_head"]
    Dh = H // nH
    past_len = pastkv[0][0].shape[2]
    T = past_len + S

    # embeddings (gather = glue; no clean Pallas equivalent needed here)
    positions = past_len + jnp.arange(S)
    x = (params["wte"][input_ids] + params["wpe"][positions][None, :, :])
    x = x.reshape(B * S, H)                                           # [B*S, H]

    # HF-style additive padding bias over past+current keys; causal part is
    # generated inside the attention kernel.
    pad_bias = ((1.0 - mask.astype(jnp.float32)) * -1e9).reshape(B, 1, T)

    presents = []
    for l, lp in enumerate(params["layers"]):
        pk, pv = pastkv[l]

        # LN1 + QKV projection (fused)
        qkv = ln_linear(x, lp["ln1_g"], lp["ln1_b"], lp["w_qkv"], lp["b_qkv"])

        # attention over all heads; also emits presents (past ++ new KV)
        ctx, k_out, v_out = attention(
            qkv.reshape(B, S, 3 * H), pk, pv, pad_bias,
            n_head=nH, head_dim=Dh, past_len=past_len)
        presents.append((k_out, v_out))

        # output projection + residual (fused)
        x = linear_residual(ctx.reshape(B * S, H), lp["w_o"], lp["b_o"], x)

        # LN2 + MLP (fc + gelu + proj) + residual (single fused kernel)
        x = ln_mlp_residual(x, lp["ln2_g"], lp["ln2_b"],
                            lp["w_fc"], lp["b_fc"], lp["w_proj"], lp["b_proj"])

    # final LN + lm_head (fused)
    logits = ln_linear(x, params["ln_f_g"], params["ln_f_b"],
                       params["lm_head_w"], params["lm_head_b"])
    return logits.reshape(B, S, cfg["vocab"]), tuple(presents)


# ----------------------------------- main ----------------------------------- #

if __name__ == "__main__":
    cfg = dict(vocab=64, hidden=32, n_head=4, n_layer=2, max_pos=64)
    B, S, past_len = 2, 8, 8
    nH, Dh = cfg["n_head"], cfg["hidden"] // cfg["n_head"]

    key = jax.random.PRNGKey(0)
    k_ids, k_past = jax.random.split(key)
    input_ids = jax.random.randint(k_ids, (B, S), 0, cfg["vocab"], dtype=jnp.int32)
    pastkv = tuple(
        (
            jax.random.normal(jax.random.fold_in(k_past, 2 * l),
                              (B, nH, past_len, Dh), jnp.float32) * 0.1,
            jax.random.normal(jax.random.fold_in(k_past, 2 * l + 1),
                              (B, nH, past_len, Dh), jnp.float32) * 0.1,
        )
        for l in range(cfg["n_layer"])
    )
    mask = jnp.ones((B, past_len + S), dtype=jnp.int32)   # mask over past + current

    params = init_params(jax.random.PRNGKey(42), cfg)

    logits, presents = net_forward(params, input_ids, pastkv, mask, cfg)
    jax.block_until_ready(logits)
    jax.block_until_ready(presents)

    assert logits.shape == (B, S, cfg["vocab"])
    assert presents[0][0].shape == (B, nH, past_len + S, Dh)
    assert presents[0][1].shape == (B, nH, past_len + S, Dh)
    print("KERNEL_OK")
</pallas_src>

<mosaic_0001>
module attributes {stable_mosaic.version = 11 : i64} {
  func.func @_ln_linear_kernel(%arg0: i32, %arg1: i32, %arg2: memref<8x32xf32, #tpu.memory_space<vmem>>, %arg3: memref<1x32xf32, #tpu.memory_space<vmem>>, %arg4: memref<1x32xf32, #tpu.memory_space<vmem>>, %arg5: memref<32x96xbf16, #tpu.memory_space<vmem>>, %arg6: memref<1x96xf32, #tpu.memory_space<vmem>>, %arg7: memref<8x96xf32, #tpu.memory_space<vmem>>) attributes {dimension_semantics = [#tpu.dimension_semantics<parallel>, #tpu.dimension_semantics<parallel>], iteration_bounds = array<i64: 2, 1>, scalar_prefetch = 0 : i64, scratch_operands = 0 : i64, tpu.core_type = #tpu.core_type<tc>, window_params = [{transform_indices = @transform_0, window_bounds = array<i64: 8, 32>}, {pipeline_mode = #tpu.pipeline_mode<synchronous>, transform_indices = @transform_1, window_bounds = array<i64: 1, 32>}, {pipeline_mode = #tpu.pipeline_mode<synchronous>, transform_indices = @transform_2, window_bounds = array<i64: 1, 32>}, {transform_indices = @transform_3, window_bounds = array<i64: 32, 96>}, {transform_indices = @transform_4, window_bounds = array<i64: 1, 96>}, {transform_indices = @transform_5, window_bounds = array<i64: 8, 96>}]} {
    %c0 = arith.constant 0 : index
    %c0_0 = arith.constant 0 : index
    %0 = vector.load %arg2[%c0, %c0_0] : memref<8x32xf32, #tpu.memory_space<vmem>>, vector<8x32xf32>
    %cst = arith.constant dense<0.000000e+00> : vector<8xf32>
    %1 = vector.multi_reduction <add>, %0, %cst [1] : vector<8x32xf32> to vector<8xf32>
    %2 = vector.shape_cast %1 : vector<8xf32> to vector<8x1xf32>
    %cst_1 = arith.constant 3.200000e+01 : f32
    %3 = vector.broadcast %cst_1 : f32 to vector<8x1xf32>
    %4 = arith.divf %2, %3 : vector<8x1xf32>
    %5 = vector.broadcast %4 : vector<8x1xf32> to vector<8x32xf32>
    %6 = arith.subf %0, %5 : vector<8x32xf32>
    %7 = arith.mulf %6, %6 : vector<8x32xf32>
    %cst_2 = arith.constant dense<0.000000e+00> : vector<8xf32>
    %8 = vector.multi_reduction <add>, %7, %cst_2 [1] : vector<8x32xf32> to vector<8xf32>
    %9 = vector.shape_cast %8 : vector<8xf32> to vector<8x1xf32>
    %cst_3 = arith.constant 3.200000e+01 : f32
    %10 = vector.broadcast %cst_3 : f32 to vector<8x1xf32>
    %11 = arith.divf %9, %10 : vector<8x1xf32>
    %12 = vector.broadcast %4 : vector<8x1xf32> to vector<8x32xf32>
    %13 = arith.subf %0, %12 : vector<8x32xf32>
    %cst_4 = arith.constant 9.99999974E-6 : f32
    %14 = vector.broadcast %cst_4 : f32 to vector<8x1xf32>
    %15 = arith.addf %11, %14 : vector<8x1xf32>
    %16 = math.rsqrt %15 : vector<8x1xf32>
    %17 = vector.broadcast %16 : vector<8x1xf32> to vector<8x32xf32>
    %18 = arith.mulf %13, %17 : vector<8x32xf32>
    %c0_5 = arith.constant 0 : index
    %c0_6 = arith.constant 0 : index
    %19 = vector.load %arg3[%c0_5, %c0_6] : memref<1x32xf32, #tpu.memory_space<vmem>>, vector<1x32xf32>
    %20 = vector.broadcast %19 : vector<1x32xf32> to vector<8x32xf32>
    %21 = arith.mulf %18, %20 : vector<8x32xf32>
    %c0_7 = arith.constant 0 : index
    %c0_8 = arith.constant 0 : index
    %22 = vector.load %arg4[%c0_7, %c0_8] : memref<1x32xf32, #tpu.memory_space<vmem>>, vector<1x32xf32>
    %23 = vector.broadcast %22 : vector<1x32xf32> to vector<8x32xf32>
    %24 = arith.addf %21, %23 : vector<8x32xf32>
    %25 = arith.truncf %24 : vector<8x32xf32> to vector<8x32xbf16>
    %c0_9 = arith.constant 0 : index
    %c0_10 = arith.constant 0 : index
    %26 = vector.load %arg5[%c0_9, %c0_10] : memref<32x96xbf16, #tpu.memory_space<vmem>>, vector<32x96xbf16>
    %cst_11 = arith.constant dense<0.000000e+00> : vector<8x96xf32>
    %27 = tpu.matmul %25, %26, %cst_11 {dimension_numbers = #tpu.dot_dimension_numbers<[1], [0], [0], [1], [0, 0, 1, 1], [], []>} : vector<8x32xbf16>, vector<32x96xbf16>, vector<8x96xf32> -> vector<8x96xf32>
    %c0_12 = arith.constant 0 : index
    %c0_13 = arith.constant 0 : index
    %28 = vector.load %arg6[%c0_12, %c0_13] : memref<1x96xf32, #tpu.memory_space<vmem>>, vector<1x96xf32>
    %29 = vector.broadcast %28 : vector<1x96xf32> to vector<8x96xf32>
    %30 = arith.addf %27, %29 : vector<8x96xf32>
    %c0_14 = arith.constant 0 : index
    %c0_15 = arith.constant 0 : index
    %31 = vector.load %arg7[%c0_14, %c0_15] : memref<8x96xf32, #tpu.memory_space<vmem>>, vector<8x96xf32>
    tpu.vector_store %arg7[%c0_14, %c0_15], %30 {strides = array<i32>} : memref<8x96xf32, #tpu.memory_space<vmem>>, vector<8x96xf32>,
    return
  }
  func.func @transform_0(%arg0: i32, %arg1: i32) -> (i32, i32) {
    %c0_i32 = arith.constant 0 : i32
    %c0_i32_0 = arith.constant 0 : i32
    return %arg0, %c0_i32 : i32, i32
  }
  func.func @transform_1(%arg0: i32, %arg1: i32) -> (i32, i32) {
    %c0_i32 = arith.constant 0 : i32
    %c0_i32_0 = arith.constant 0 : i32
    %c0_i32_1 = arith.constant 0 : i32
    return %c0_i32, %c0_i32_0 : i32, i32
  }
  func.func @transform_2(%arg0: i32, %arg1: i32) -> (i32, i32) {
    %c0_i32 = arith.constant 0 : i32
    %c0_i32_0 = arith.constant 0 : i32
    %c0_i32_1 = arith.constant 0 : i32
    return %c0_i32, %c0_i32_0 : i32, i32
  }
  func.func @transform_3(%arg0: i32, %arg1: i32) -> (i32, i32) {
    %c0_i32 = arith.constant 0 : i32
    %c0_i32_0 = arith.constant 0 : i32
    return %c0_i32, %arg1 : i32, i32
  }
  func.func @transform_4(%arg0: i32, %arg1: i32) -> (i32, i32) {
    %c0_i32 = arith.constant 0 : i32
    %c0_i32_0 = arith.constant 0 : i32
    return %c0_i32, %arg1 : i32, i32
  }
  func.func @transform_5(%arg0: i32, %arg1: i32) -> (i32, i32) {
    %c0_i32 = arith.constant 0 : i32
    return %arg0, %arg1 : i32, i32
  }
}

</mosaic_0001>

<bundles_post_ra>
// kernel: tpu_custom_call.1
= control target key start
LH: loop header
LB: loop body
LE: loop exit
PB: predicated region body
PF: predicated region fallthrough
CT: control target
= control target key end

     0   :  { %10 = vsyncpa [#allocation3], 0  ;;  %s1037_s0 = inlined_call_operand.hbm [shape: f32[16,32], index: 0, kind: input, shape index: {}]   ;;  %s1038_s1 = inlined_call_operand.vmem [shape: f32[1,32], index: 1, kind: input, shape index: {}]   ;;  %s1039_s2 = inlined_call_operand.vmem [shape: f32[1,32], index: 2, kind: input, shape index: {}]   ;;  %s1040_s3 = inlined_call_operand.hbm [shape: bf16[32,96], index: 3, kind: input, shape index: {}]   ;;  %s1041_s4 = inlined_call_operand.vmem [shape: f32[1,96], index: 4, kind: input, shape index: {}]   ;;  %s1042_s5 = inlined_call_operand.hbm [shape: f32[16,96], index: 5, kind: output, shape index: {}]  }
   0x1   :  { %12 = vsyncpa [#allocation3 + $0x1], 0 }
   0x2   :  { %13 = vsyncpa [#allocation6], 0 }
   0x3   :  { %14 = vsyncpa [#allocation4], 0 }
   0x4   :  { %16 = vsyncpa [#allocation4 + $0x1], 0  ;;  %s807_s18 = smov 0   ;;  %s809_s19 = smov 0  }
   0x5   :  { %s811_s20 = smov 0   ;;  %s813_s21 = smov 0  }
   0x6   :  { %s815_s22 = smov 0   ;;  %s817_s23 = smov 0  }
   0x7 LB: > { %s510_s24 = sadd.s32 4294967295, %s768_s23   ;;  %s511_s25 = sadd.s32 4294967294, %s768_s23   ;;  %s768_s23 = sphi %s817_s23, %s22_s23   ;;  %s764_s22 = sphi %s815_s22, %s1066_s22   ;;  %s760_s21 = sphi %s813_s21, %s1065_s21   ;;  %s756_s20 = sphi %s811_s20, %s1064_s20   ;;  %s752_s19 = sphi %s809_s19, %s1063_s19   ;;  %s748_s18 = sphi %s807_s18, %s1062_s18  }
   0x8   : > { %p54_p0 = scmp.ne.s32.totalorder %s752_s19, %s748_s18  ;;  %p841_p1 = scmp.eq.s32.totalorder %s510_s24, 0 }
   0x9   : > { %p845_p2 = scmp.eq.s32.totalorder %s510_s24, 1  ;;  %p180_p3 = scmp.eq.s32.totalorder %s511_s25, 1 }
   0xa   : > { %s1047_s26 = scalar_select %p841_p1, 1, 0 }
   0xb   : > { %s1048_s27 = scalar_select %p845_p2, 1, 0 }
   0xc   : > { %p851_p4 = por %p841_p1, %p54_p0  ;;  %p512_p5 = scmp.ge.s32.totalorder %s768_s23, 1 }
   0xd   : > { %p856_p6 = por %p180_p3, %p54_p0  ;;  %p187_p7 = scmp.lt.s32.totalorder %s768_s23, 3 }
   0xe   : > { %s1049_s28 = scalar_select %p851_p4, 1, 0 }
   0xf   : > { %s1050_s29 = scalar_select %p856_p6, 1, 0 }
  0x10   : > { %p861_p8 = pnand %p512_p5, %p187_p7  ;;  %s770_s6 = smov [#allocation5]  }
  0x11   : > { %s207_s7 = sshll.u32 %s770_s6, 4  ;;  %s34_s9 = sadd.s32 1, %s764_s22  ;;  %s208_s7 = int_to_ptr.vmem [resolvable:$true] %s207_s7 }
  0x12   : > { %s1051_s30 = scalar_select %p861_p8, 1, 0 }
  0x13   : > { %p551_p9 = pneg %p861_p8  ;;  %s624_s12 = scalar_lea.hbm %s1040_s3, 256 }
  0x14   : > { %p625_p12 = scmp.ne.s32.totalorder %s1040_s3, %s624_s12  ;;  %p631_p5 = scmp.lt.u32.totalorder %s624_s12, %s1040_s3 }
  0x15   : > { %p870_p11 = pnand %p551_p9, %p841_p1 }
  0x17   : > { %p626_p13 = pneg %p870_p11 }
  0x19   : > { %p627_p0 = pnand %p626_p13, %p625_p12 }
  0x1b   : > { %p628_p3 = pneg %p627_p0 }
  0x1d   : > { %p633_p7 = pnand %p631_p5, %p628_p3 }
  0x1f   : > { %636 = shalt.err (!%p633_p7)
}
  0x20   : > { %s637_s17 = scalar_lea.vmem %s208_s7, 256  ;;  %p645_p1 = scmp.lt.s32.totalorder %s208_s7, %s208_s7 }
  0x21   : > { %p638_p9 = scmp.ne.s32.totalorder %s208_s7, %s637_s17  ;;  %p646_p4 = scmp.lt.s32.totalorder %s637_s17, %s637_s17 }
  0x23   : > { %p640_p10 = pnand %p638_p9, %p626_p13  ;;  %p647_p8 = por %p646_p4, %p645_p1 }
  0x25   : > { %p641_p6 = pneg %p640_p10 }
  0x27   : > { %p648_p2 = pnand %p647_p8, %p641_p6 }
  0x29   : > { %651 = shalt.err (!%p648_p2)
}
  0x2a   : > { %s771_s24 = smov 64   ;;  %s772_s25 = smov 4  }
  0x2b   : > { %554 = dma.hbm_to_vmem [thread:$0]  (!%p870_p11), %s1040_s3, 256, %s208_s7, [#allocation6], %s771_s24, %s771_s24, %s772_s25  }
  0x2c   : > { %p36_p1 = scmp.ge.s32.totalorder %s34_s9, 2  ;;  %s41_s11 = sadd.s32 1, %s756_s20 }
  0x2d   : > { %p48_p2 = scmp.ne.s32.totalorder %s756_s20, %s752_s19  ;;  %p49_p4 = scmp.eq.s32.totalorder %s768_s23, 0 }
  0x2e   : > { %s1068_s9 = smov (%p36_p1, %s34_s9), 0  ;;  %p1054_p8 = scmp.ne.s32.totalorder %s1048_s27, 0 }
  0x2f   : > { %p897_p6 = por %p49_p4, %p48_p2  ;;  %s38_s8 = ssub.s32 %s764_s22, %s1068_s9 }
  0x30   : > { %p903_p10 = por %p1054_p8, %p48_p2  ;;  %p564_p12 = scmp.lt.s32.totalorder %s768_s23, 2 }
  0x31   : > { %p39_p11 = scmp.eq.s32.totalorder %s38_s8, 0  ;;  %s227_s7 = sand.u32 1, %s756_s20  }
  0x32   : > { %s516_s14 = sshll.u32 %s227_s7, 3  ;;  %s517_s16 = sshll.u32 %s764_s22, 7 }
  0x33   : > { %s912_s15 = scalar_select %p39_p11, %s756_s20, %s41_s11  }
  0x34   : > { %s918_s25 = scalar_lea.hbm %s1037_s0, %s517_s16  ;;  %s231_s27 = scalar_lea.vmem [#allocation2], %s516_s14 }
  0x35   : > { %s238_s6 = sshll.u32 %s231_s27, 4  ;;  %p924_p13 = pnand %p564_p12, %p897_p6  ;;  %s920_s6 = int_to_ptr.vmem [resolvable:$true] %s238_s6 }
  0x36   : > { %s228_s11 = scalar_lea.sflag [#allocation3], %s227_s7  ;;  %s652_s8 = scalar_lea.hbm %s918_s25, 128 }
  0x37   : > { %p653_p0 = scmp.ne.s32.totalorder %s918_s25, %s652_s8  ;;  %p654_p3 = pneg %p924_p13 }
  0x38   : > { %s657_s17 = scalar_lea.hbm %s1037_s0, 256  ;;  %p658_p9 = scmp.lt.u32.totalorder %s918_s25, %s1037_s0 }
  0x39   : > { %p655_p5 = pnand %p654_p3, %p653_p0  ;;  %p659_p1 = scmp.lt.u32.totalorder %s657_s17, %s652_s8 }
  0x3a   : > { %p661_p4 = scmp.lt.u32.totalorder %s652_s8, %s918_s25 }
  0x3b   : > { %p656_p7 = pneg %p655_p5  ;;  %p660_p2 = por %p659_p1, %p658_p9 }
  0x3d   : > { %p662_p6 = por %p661_p4, %p660_p2 }
  0x3f   : > { %p663_p8 = pnand %p662_p6, %p656_p7 }
  0x41   : > { %666 = shalt.err (!%p663_p8)
}
  0x42   : > { %s667_s7 = scalar_lea.vmem %s920_s6, 128  ;;  %s773_s27 = smov [#allocation2]  }
  0x43   : > { %p668_p12 = scmp.ne.s32.totalorder %s920_s6, %s667_s7  ;;  %s672_s14 = sshll.u32 %s773_s27, 4  ;;  %s673_s14 = int_to_ptr.vmem [resolvable:$false] %s672_s14 }
  0x44   : > { %s674_s16 = scalar_lea.vmem %s673_s14, 256  ;;  %p675_p5 = scmp.lt.s32.totalorder %s920_s6, %s673_s14 }
  0x45   : > { %p670_p11 = pnand %p668_p12, %p654_p3  ;;  %p676_p9 = scmp.lt.s32.totalorder %s674_s16, %s667_s7 }
  0x47   : > { %p671_p0 = pneg %p670_p11  ;;  %p677_p1 = por %p676_p9, %p675_p5 }
  0x49   : > { %p678_p2 = pnand %p677_p1, %p671_p0 }
  0x4b   : > { %681 = shalt.err (!%p678_p2)
}
  0x4c   : > { %558 = dma.hbm_to_vmem [thread:$0]  (!%p924_p13), %s918_s25, 128, %s920_s6, %s228_s11  }
  0x4d   : > { %p1057_p7 = scmp.ne.s32.totalorder %s1051_s30, 0 }
  0x4e   : > { %s956_s8 = sand.u32 (!%p1057_p7), 1, %s752_s19   ;;  %p1058_p3 = scmp.ne.s32.totalorder (!%p1057_p7), %s1049_s28, 0 }
  0x4f   : > { %247 = sbr.rel (%p1057_p7) target bundleno = 634 (0x27a), region = 40  ;;  %s519_s17 = sshll.u32 (!%p1057_p7), %s956_s8, 3 }
  0x50   : > { %s250_s12 = scalar_lea.sflag (!%p1057_p7), [#allocation3], %s956_s8  ;;  %s253_s24 = scalar_lea.vmem (!%p1057_p7), [#allocation2], %s519_s17 }
  0x56   : > { %735 = dma.done.wait (%p1058_p3), %s250_s12, 128  }
  0x57   : > { %737 = vsyncadd (%p1058_p3), %s250_s12, 4294967168  ;;  %p1059_p13 = scmp.ne.s32.totalorder %s1047_s26, 0 }
  0x59   : > { %739 = dma.done.wait (%p1059_p13), [#allocation6], 256  }
  0x5a   : > { %741 = vsyncadd (%p1059_p13), [#allocation6], 4294967040  ;;  %vm292_vm0 = vcmask 261120   ;;  %v291_v0 = vld [vmem:[%s253_s24] sm:$0xff]  ;;  %v620_v7 = vld [vmem:[#allocation5] sm:$0xff]   ;;  %v774_v8 = vmov 0.0  }
  0x5b   : > { %v293_v1 = vsel %vm292_vm0, %v291_v0, 0.0  ;;  %535 = vmatprep.subr.bf16.mxu0 %v774_v8  ;;  %v621_v9 = vld [vmem:[#allocation5 + $0x8] sm:$0xff]   ;;  %vm775_vm1 = vmmov 0   ;;  %v522_v14 = vld [vmem:[%s1038_s1] ss:$0 sm:$0xff]  ;;  %s529_s11 = sshll.u32 %s760_s21, 7 }
  0x5c   : > { %294 = vadd.xlane.f32.xlu0 %v293_v1  ;;  %536 = vmatpush3.bf16.msra.mxu0 %v620_v7  ;;  %v523_v16 = vld [vmem:[%s1039_s2] ss:$0 sm:$0xff]  ;;  %s286_s7 = scalar_lea.vmem [#allocation7], %s519_s17  ;;  %vm390_vm2 = vcmask 785408   ;;  %s988_s12 = scalar_lea.hbm %s1042_s5, %s529_s11 }
  0x5d   : > { %539 = vmatprep.mubr.msk.bf16.mxu0 %vm775_vm1, %v774_v8  ;;  %537 = vmatprep.subr.bf16.mxu0 %v774_v8  ;;  %v524_v20 = vld [vmem:[%s1041_s4] ss:$0 sm:$0xff]  ;;  %s407_s27 = sshll.u32 %s286_s7, 4  ;;  %s393_s21 = scalar_lea.sflag [#allocation4], %s956_s8  ;;  %s990_s27 = int_to_ptr.vmem [resolvable:$true] %s407_s27 }
  0x5e   : > { %s682_s17 = scalar_lea.vmem %s990_s27, 128  ;;  %s776_s24 = smov [#allocation7]  }
  0x5f   : > { %p683_p4 = scmp.ne.s32.totalorder %s990_s27, %s682_s17  ;;  %s686_s26 = sshll.u32 %s776_s24, 4  ;;  %s687_s26 = int_to_ptr.vmem [resolvable:$false] %s686_s26 }
  0x60   : > { %538 = vmatpush3.bf16.msra.mxu0 %v621_v9  ;;  %s688_s28 = scalar_lea.vmem %s687_s26, 256  ;;  %p689_p12 = scmp.lt.s32.totalorder %s990_s27, %s687_s26 }
  0x61   : > { %p684_p6 = pnand %p683_p4, %p903_p10  ;;  %p690_p11 = scmp.lt.s32.totalorder %s688_s28, %s682_s17 }
  0x63   : > { %p685_p8 = pneg %p684_p6  ;;  %p691_p0 = por %p690_p11, %p689_p12 }
  0x65   : > { %p692_p5 = pnand %p691_p0, %p685_p8 }
  0xe9   : > { %v295_v2 = vpop.xlane.xlu0 %294 }
  0xea   : > { %v297_v3 = vmul.f32 0.03125, %v295_v2 }
  0xec   : > { %v298_v4 = vsub.f32 %v291_v0, %v297_v3 }
  0xee   : > { %v299_v5 = vmul.f32 %v298_v4, %v298_v4 }
  0xf0   : > { %v300_v6 = vsel %vm292_vm0, %v299_v5, 0.0 }
  0xf1   : > { %301 = vadd.xlane.f32.xlu0 %v300_v6 }
 0x17e   : > { %v302_v10 = vpop.xlane.xlu0 %301 }
 0x17f   : > { %v303_v11 = vmul.f32 0.03125, %v302_v10 }
 0x181   : > { %v304_v12 = vadd.f32 1e-05, %v303_v11 }
 0x183   : > { %622 = vrsqrt.f32 %v304_v12 }
 0x18d   : > { %v623_v13 = vpop.eup %622 }
 0x18e   : > { %v306_v15 = vmul.f32 %v623_v13, %v298_v4 }
 0x190   : > { %v314_v17 = vmul.f32 %v522_v14, %v306_v15 }
 0x192   : > { %v322_v18 = vadd.f32 %v523_v16, %v314_v17 }
 0x194   : > { %v323_v19 = vpack.c.bf16 %v322_v18, %v322_v18 }
 0x196   : > { %540 = vmatmul.mubr.msk.bf16.vlgmr.msra.gmra.mrb[0].mxu0 %vm292_vm0, %v323_v19 }
 0x269   : > { %v384_v21 = vpop.f32.mrb[0].mxu0 }
 0x26a   : > { %v385_v22 = vadd.f32 %v524_v20, %v384_v21  ;;  %v541_v23 = vpop.f32.mrb[1].mxu0 }
 0x26b   : > { %v387_v24 = vpop.f32.mrb[2].mxu0 }
 0x26c   : > { %v542_v25 = vpop.f32.mrb[3].mxu0  ;;  %391 = vst.msk [vmem:[%s286_s7] sm:$0xff] %vm390_vm2, %v385_v22 }
 0x26d   : > { %695 = shalt.err (!%p692_p5)
}
 0x26e   : > { %s696_s8 = scalar_lea.hbm %s988_s12, 128  ;;  %s700_s6 = scalar_lea.hbm %s1042_s5, 256 }
 0x26f   : > { %p697_p9 = scmp.ne.s32.totalorder %s988_s12, %s696_s8  ;;  %p701_p7 = scmp.lt.u32.totalorder %s988_s12, %s1042_s5 }
 0x270   : > { %p702_p3 = scmp.lt.u32.totalorder %s700_s6, %s696_s8  ;;  %p704_p4 = scmp.lt.u32.totalorder %s696_s8, %s988_s12 }
 0x271   : > { %p698_p1 = pnand %p697_p9, %p903_p10 }
 0x272   : > { %p703_p13 = por %p702_p3, %p701_p7 }
 0x273   : > { %p699_p2 = pneg %p698_p1 }
 0x274   : > { %p705_p6 = por %p704_p4, %p703_p13 }
 0x276   : > { %p706_p8 = pnand %p705_p6, %p699_p2 }
 0x278   : > { %709 = shalt.err (!%p706_p8)
}
 0x279   : > { %549 = dma.vmem_to_hbm [thread:$0]  (%p903_p10), %s990_s27, 128, %s988_s12, %s393_s21  }
 0x27a PF: > { %s419_s7 = sand.u32 1, %s748_s18   ;;  %p1060_p12 = scmp.ne.s32.totalorder %s1050_s29, 0 }
 0x27b   : > { %p1061_p11 = scmp.ge.s32.totalorder %s768_s23, 2  ;;  %s420_s14 = scalar_lea.sflag [#allocation4], %s419_s7 }
 0x27d   : > { %p560_p0 = pnand %p1061_p11, %p1060_p12 }
 0x27f   : > { %743 = dma.done.wait (!%p560_p0), %s420_s14, 128  }
 0x280   : > { %745 = vsyncadd (!%p560_p0), %s420_s14, 4294967168  ;;  %s22_s23 = sadd.s32 1, %s768_s23   ;;  %s1062_s18 = smov %s752_s19 }
 0x281   : > { %p19_p5 = scmp.ge.s32.totalorder %s22_s23, 4   ;;  %s1063_s19 = smov %s756_s20 }
 0x282   : > { %s1064_s20 = smov %s912_s15  ;;  %s1065_s21 = smov %s764_s22 }
 0x283   : > { %s1066_s22 = smov %s1068_s9  ;;  %21 = sbr.rel (!%p19_p5) target bundleno = 7 (0x7), region = 93 }
 0x28a   :  { %425 = vsyncpa [#allocation3], 1 }
 0x28b   :  { %427 = vsyncpa [#allocation3 + $0x1], 1 }
 0x28c   :  { %428 = vsyncpa [#allocation6], 1 }
 0x28d   :  { %429 = vsyncpa [#allocation4], 1 }
 0x28e   :  { %431 = vsyncpa [#allocation4 + $0x1], 1 }

</bundles_post_ra>
